<compile_context>
chip_gen: v7x
topology: tpu7x:2x2x1
jax: 0.10.0
libtpu: 0.0.40
codegen_flags: <defaults>
</compile_context>

<pallas_src>
import functools

import jax
import jax.numpy as jnp
from jax.experimental import pallas as pl
from jax.experimental.pallas import tpu as pltpu

_IN = 8  # Linear(8, 8) input features
_OUT = 8  # Linear(8, 8) output features


def _modelb_kernel(qw_ref, out_ref):
    # qw_ref is a single fused (16, 8) f32 block:
    #   rows 0..7  = q zero-padded to 8 rows  (batch rows + zeros)
    #   rows 8..15 = W (out, in)
    # Static, sublane-tile-aligned slices -> two sublane reduces on the XLU.
    q_col = jnp.sum(qw_ref[0:8, :], axis=0, keepdims=True)    # [1, 8] = q.sum(0)
    w_col = jnp.sum(qw_ref[8:16, :], axis=0, keepdims=True)   # [1, 8] = W.sum(0)
    # l = q.sum() + detach(q).clone().sum() = 2 * sum(q @ W.T)
    #   = 2 * dot(q.sum(0), W.sum(0))  -> one vmul + one lane reduce on the VPU/XLU.
    out_ref[0, 0] = 2.0 * jnp.sum(q_col * w_col)


@functools.partial(jax.jit, static_argnames=())
def modelb_forward(q: jax.Array, w: jax.Array):
    """q: [B, 8] float32, w: PyTorch-style Linear weight [8, 8] (out, in).

    Forward-only kernel.
    # TODO(synk): the detach() branch is folded into the constant 2; if this is
    # ever differentiated, a custom_vjp (grad factor 1 on the detached branch)
    # is required — forward value is exact.
    """
    q = q.astype(jnp.float32)
    w = w.astype(jnp.float32)
    b = q.shape[0]
    # Fuse q (padded to 8 rows) and w into one (16, 8) tile -> single input DMA.
    q_pad = jnp.zeros((8, _IN), jnp.float32).at[:b, :].set(q)
    qw = jnp.concatenate([q_pad, w], axis=0)  # [16, 8]

    l = pl.pallas_call(
        _modelb_kernel,
        out_shape=jax.ShapeDtypeStruct((1, 1), jnp.float32),
        in_specs=[pl.BlockSpec(memory_space=pltpu.VMEM)],
        out_specs=pl.BlockSpec(memory_space=pltpu.SMEM),
    )(qw)
    l = l[0, 0]
    # ModelB.forward returns (l, l)
    return (l, l)


if __name__ == "__main__":
    key = jax.random.PRNGKey(0)
    k_q, k_w = jax.random.split(key)

    # Shapes implied by Linear(8, 8): batch=2, features=8.
    q = jax.random.normal(k_q, (2, _IN), dtype=jnp.float32)
    # Deterministic init mimicking nn.Linear default (uniform in [-1/sqrt(8), 1/sqrt(8)]).
    bound = 1.0 / jnp.sqrt(8.0)
    w = jax.random.uniform(k_w, (_OUT, _IN), dtype=jnp.float32, minval=-bound, maxval=bound)

    out = modelb_forward(q, w)
    jax.block_until_ready(out)

    # Sanity check against plain-JAX reference (exact PyTorch semantics).
    y_ref = q @ w.T
    l_ref = y_ref.sum() + y_ref.sum()
    assert jnp.allclose(out[0], l_ref, rtol=1e-5, atol=1e-5)
    assert jnp.allclose(out[1], l_ref, rtol=1e-5, atol=1e-5)

    print("KERNEL_OK")
</pallas_src>

<mosaic_0001>
module attributes {stable_mosaic.version = 11 : i64} {
  func.func @_modelb_kernel(%arg0: memref<16x8xf32, #tpu.memory_space<vmem>>, %arg1: memref<1x1xf32, #tpu.memory_space<smem>>) attributes {dimension_semantics = [], scalar_prefetch = 0 : i64, scratch_operands = 0 : i64, tpu.core_type = #tpu.core_type<tc>} {
    %c0 = arith.constant 0 : index
    %c0_0 = arith.constant 0 : index
    %0 = vector.load %arg0[%c0, %c0_0] : memref<16x8xf32, #tpu.memory_space<vmem>>, vector<8x8xf32>
    %cst = arith.constant dense<0.000000e+00> : vector<8xf32>
    %1 = vector.multi_reduction <add>, %0, %cst [0] : vector<8x8xf32> to vector<8xf32>
    %2 = vector.shape_cast %1 : vector<8xf32> to vector<1x8xf32>
    %c8 = arith.constant 8 : index
    %c0_1 = arith.constant 0 : index
    %3 = vector.load %arg0[%c8, %c0_1] : memref<16x8xf32, #tpu.memory_space<vmem>>, vector<8x8xf32>
    %cst_2 = arith.constant dense<0.000000e+00> : vector<8xf32>
    %4 = vector.multi_reduction <add>, %3, %cst_2 [0] : vector<8x8xf32> to vector<8xf32>
    %5 = vector.shape_cast %4 : vector<8xf32> to vector<1x8xf32>
    %6 = arith.mulf %2, %5 : vector<1x8xf32>
    %7 = vector.shape_cast %6 : vector<1x8xf32> to vector<1x1x8xf32>
    %cst_3 = arith.constant dense<0.000000e+00> : vector<1xf32>
    %8 = vector.multi_reduction <add>, %7, %cst_3 [1, 2] : vector<1x1x8xf32> to vector<1xf32>
    %9 = vector.shape_cast %8 : vector<1xf32> to vector<1x1x1xf32>
    %10 = vector.extract %9[0, 0, 0] : f32 from vector<1x1x1xf32>
    %cst_4 = arith.constant 2.000000e+00 : f32
    %11 = arith.mulf %cst_4, %10 : f32
    %c0_5 = arith.constant 0 : index
    %c0_6 = arith.constant 0 : index
    %12 = memref.load %arg1[%c0_5, %c0_6] : memref<1x1xf32, #tpu.memory_space<smem>>
    memref.store %11, %arg1[%c0_5, %c0_6] : memref<1x1xf32, #tpu.memory_space<smem>>
    return
  }
}

</mosaic_0001>

<bundles_post_ra>
// kernel: modelb_forward.1
= control target key start
LH: loop header
LB: loop body
LE: loop exit
PB: predicated region body
PF: predicated region fallthrough
CT: control target
= control target key end

     0   :  { %vm10_vm0 = vcmask 64512   ;;  %s98_s0 = inlined_call_operand.vmem [shape: f32[16,8], index: 0, kind: input, shape index: {}]   ;;  %s99_s1 = inlined_call_operand.hbm [shape: f32[1,1], index: 1, kind: output, shape index: {}]  }
   0x1   :  { %v9_v0 = vld [vmem:[%s98_s0] sm:$0xff]  ;;  %v18_v1 = vld [vmem:[%s98_s0 + $0x8] sm:$0xff] }
   0x2   :  { %6 = vsyncpa [#allocation3], 0  ;;  %v11_v2 = vsel %vm10_vm0, %v9_v0, 0.0  ;;  %v19_v3 = vsel %vm10_vm0, %v18_v1, 0.0  ;;  %vm27_vm1 = vcmask 57344   ;;  %s57_s13 = scalar_lea.hbm %s99_s1, 16 }
   0x3   :  { %v12_v4 = vrot.slane %v11_v2, 4  ;;  %v20_v5 = vrot.slane %v19_v3, 4  ;;  %p58_p0 = scmp.ne.s32.totalorder %s99_s1, %s57_s13  ;;  %p61_p1 = scmp.lt.u32.totalorder %s57_s13, %s99_s1 }
   0x5   :  { %v13_v6 = vadd.f32 %v12_v4, %v11_v2  ;;  %v21_v7 = vadd.f32 %v20_v5, %v19_v3  ;;  %p63_p2 = pnand %p61_p1, %p58_p0 }
   0x7   :  { %v14_v8 = vrot.slane %v13_v6, 2  ;;  %v22_v9 = vrot.slane %v21_v7, 2 }
   0x9   :  { %v15_v10 = vadd.f32 %v14_v8, %v13_v6  ;;  %v23_v11 = vadd.f32 %v22_v9, %v21_v7 }
   0xb   :  { %v16_v12 = vrot.slane %v15_v10, 1  ;;  %v24_v13 = vrot.slane %v23_v11, 1 }
   0xd   :  { %v17_v14 = vadd.f32 %v16_v12, %v15_v10  ;;  %v25_v15 = vadd.f32 %v24_v13, %v23_v11 }
   0xf   :  { %v26_v16 = vmul.f32 %v25_v15, %v17_v14 }
  0x11   :  { %v28_v17 = vsel %vm27_vm1, %v26_v16, 0.0 }
  0x12   :  { %29 = vadd.xlane.f32.xlu0 %v28_v17 }
  0x9f   :  { %v30_v18 = vpop.xlane.xlu0 %29 }
  0xa0   :  { %v31_v19 = vrot.slane %v30_v18, 4 }
  0xa2   :  { %v32_v20 = vadd.f32 %v31_v19, %v30_v18 }
  0xa4   :  { %v33_v21 = vrot.slane %v32_v20, 2 }
  0xa6   :  { %v34_v22 = vadd.f32 %v33_v21, %v32_v20 }
  0xa8   :  { %v35_v23 = vrot.slane %v34_v22, 1 }
  0xaa   :  { %v36_v24 = vadd.f32 %v35_v23, %v34_v22 }
  0xac   :  { %54 = vpush %v36_v24 }
  0xdd   :  { %s55_s0 = spop %54 }
  0xde   :  { %s38_s10 = smul.f32 2.0, %s55_s0 }
  0xe0   :  { %40 = sst [smem:[#allocation2]] %s38_s10 }
  0xe1   :  { %66 = shalt.err (!%p63_p2)
}
  0xe2   :  { %s69_s18 = smov [#allocation2]  }
  0xe3   :  { %48 = dma.smem_to_hbm %s69_s18, 16, %s99_s1, [#allocation3]  }
  0xe4   :  { %67 = dma.done.wait [#allocation3], 16  }
  0xe5   :  { %68 = vsyncadd [#allocation3], 4294967280 }
  0xe6   :  { %52 = sfence }
  0xe7   :  { %53 = vsyncpa [#allocation3], 1 }

</bundles_post_ra>
